<compile_context>
chip_gen: v7x
topology: tpu7x:2x2x1
jax: 0.10.0
libtpu: 0.0.40
codegen_flags: <defaults>
</compile_context>

<pallas_src>
import functools

import jax
import jax.numpy as jnp
from jax.experimental import pallas as pl
from jax.experimental.pallas import tpu as pltpu

LANE = 128     # TPU lane width   (last dim)
SUBLANE = 8    # f32 sublane width (second-to-last dim)


def _round_up(n: int, m: int) -> int:
    return ((n + m - 1) // m) * m


def _pad2d(a, rows, cols):
    r, c = a.shape
    return jnp.pad(a, ((0, rows - r), (0, cols - c)))


def _fused_mdn_kernel(*refs, n_hidden: int, n_mixtures: int, compute_dtype):
    """Fused MLP + MDN head on one batch tile.

    refs = [x, (w, b) * n_hidden, w_mu, b_mu, w_sig, b_sig, w_pi, b_pi,
            mu_out, sigma_out, pi_out]
    All feature dims are zero-padded to multiples of 128 (lane-dense).
    """
    x_ref = refs[0]
    k = 1
    h = x_ref[...].astype(jnp.float32)
    for _ in range(n_hidden):
        w = refs[k][...]
        b = refs[k + 1][...]                      # (1, D) -> broadcasts over rows
        k += 2
        h = jnp.dot(h.astype(compute_dtype), w.astype(compute_dtype),
                    preferred_element_type=jnp.float32) + b
        h = jnp.maximum(h, 0.0)                   # ReLU in f32

    w_mu, b_mu = refs[k][...], refs[k + 1][...]
    w_sg, b_sg = refs[k + 2][...], refs[k + 3][...]
    w_pi, b_pi = refs[k + 4][...], refs[k + 5][...]
    mu_ref, sigma_ref, pi_ref = refs[k + 6], refs[k + 7], refs[k + 8]

    hc = h.astype(compute_dtype)
    mu = jnp.dot(hc, w_mu.astype(compute_dtype),
                 preferred_element_type=jnp.float32) + b_mu
    log_sigma = jnp.dot(hc, w_sg.astype(compute_dtype),
                        preferred_element_type=jnp.float32) + b_sg
    logits = jnp.dot(hc, w_pi.astype(compute_dtype),
                     preferred_element_type=jnp.float32) + b_pi

    # Softmax over the first n_mixtures lanes only (the rest is zero padding).
    col = jax.lax.broadcasted_iota(jnp.int32, logits.shape, 1)
    logits = jnp.where(col < n_mixtures, logits, -jnp.inf)
    m = jnp.max(logits, axis=-1, keepdims=True)
    e = jnp.exp(logits - m)
    pi = e / jnp.sum(e, axis=-1, keepdims=True)

    mu_ref[...] = mu.astype(mu_ref.dtype)
    sigma_ref[...] = jnp.exp(log_sigma).astype(sigma_ref.dtype)
    pi_ref[...] = pi.astype(pi_ref.dtype)


def init_linear_mdn_params(key, input_dimension, hidden_dims,
                           output_dimension, n_mixtures, dtype=jnp.float32):
    """Mirror the PyTorch module: hidden Linear layers, then one head Linear of
    width (output_dimension + 2) * n_mixtures.  Uniform(-1/sqrt(fan_in), ...)."""
    dims = [input_dimension] + list(hidden_dims) + [
        (output_dimension + 2) * n_mixtures]
    params = []
    for i in range(len(dims) - 1):
        d_in, d_out = dims[i], dims[i + 1]
        key, kw, kb = jax.random.split(key, 3)
        bound = 1.0 / (d_in ** 0.5)
        w_t = jax.random.uniform(kw, (d_in, d_out), dtype, -bound, bound)
        b = jax.random.uniform(kb, (d_out,), dtype, -bound, bound)
        params.append((w_t, b))
    return params


def pack_linear_mdn_params(params, output_dimension, n_mixtures):
    """Split the head layer into mu / log_sigma / pi_logit pieces and zero-pad
    every weight / bias to lane-dense (multiple-of-128) shapes (done once)."""
    *hidden, (w_last, b_last) = params
    K, D = n_mixtures, output_dimension

    packed_hidden = []
    for (w, b) in hidden:
        d_in, d_out = w.shape
        wp = _pad2d(w, _round_up(d_in, LANE), _round_up(d_out, LANE))
        bp = _pad2d(b.reshape(1, -1), 1, _round_up(d_out, LANE))
        packed_hidden.append((wp, bp))

    d_in_p = _round_up(w_last.shape[0], LANE)

    def head_piece(lo, hi):
        wp = _pad2d(w_last[:, lo:hi], d_in_p, _round_up(hi - lo, LANE))
        bp = _pad2d(b_last[lo:hi].reshape(1, -1), 1, _round_up(hi - lo, LANE))
        return wp, bp

    # TODO(synk): MixtureDensityHead source was not provided; assuming the
    # conventional packing [mu | log_sigma | pi_logits] with sigma = exp(.)
    # and pi = softmax(.).
    w_mu, b_mu = head_piece(0, K * D)
    w_sg, b_sg = head_piece(K * D, K * D + K)
    w_pi, b_pi = head_piece(K * D + K, K * D + 2 * K)
    return packed_hidden, (w_mu, b_mu, w_sg, b_sg, w_pi, b_pi)


def linear_mdn_forward(x, packed_hidden, packed_head, *,
                       output_dimension, n_mixtures,
                       batch_tile=256, compute_dtype=jnp.float32):
    """x: (B, input_dimension) -> (mu (B,K,D), sigma (B,K), pi (B,K))."""
    B, d_in = x.shape
    K, D = n_mixtures, output_dimension

    d_in_p = _round_up(d_in, LANE)
    mu_p = _round_up(K * D, LANE)
    k_p = _round_up(K, LANE)

    tb = _round_up(min(batch_tile, _round_up(B, SUBLANE)), SUBLANE)
    b_pad = _round_up(B, tb)
    x_p = _pad2d(x, b_pad, d_in_p)

    n_hidden = len(packed_hidden)
    inputs = [x_p]
    in_specs = [pl.BlockSpec((tb, d_in_p), lambda i: (i, 0))]
    for (w, b) in packed_hidden:
        inputs += [w, b]
        in_specs += [pl.BlockSpec(w.shape, lambda i: (0, 0)),
                     pl.BlockSpec(b.shape, lambda i: (0, 0))]
    for arr in packed_head:
        inputs.append(arr)
        in_specs.append(pl.BlockSpec(arr.shape, lambda i: (0, 0)))

    out_shape = (
        jax.ShapeDtypeStruct((b_pad, mu_p), x.dtype),
        jax.ShapeDtypeStruct((b_pad, k_p), x.dtype),
        jax.ShapeDtypeStruct((b_pad, k_p), x.dtype),
    )
    out_specs = (
        pl.BlockSpec((tb, mu_p), lambda i: (i, 0)),
        pl.BlockSpec((tb, k_p), lambda i: (i, 0)),
        pl.BlockSpec((tb, k_p), lambda i: (i, 0)),
    )

    kernel = functools.partial(_fused_mdn_kernel, n_hidden=n_hidden,
                               n_mixtures=K, compute_dtype=compute_dtype)

    mu_full, sigma_full, pi_full = pl.pallas_call(
        kernel,
        out_shape=out_shape,
        grid=(b_pad // tb,),
        in_specs=in_specs,
        out_specs=out_specs,
        compiler_params=pltpu.CompilerParams(
            dimension_semantics=("parallel",)),
    )(*inputs)

    mu = mu_full[:B, :K * D].reshape(B, K, D)
    sigma = sigma_full[:B, :K]
    pi = pi_full[:B, :K]
    return mu, sigma, pi


if __name__ == "__main__":
    batch = 2
    input_dimension = 32
    hidden_dims = [64, 48]
    output_dimension = 8
    n_mixtures = 5

    key = jax.random.PRNGKey(0)
    key, kx = jax.random.split(key)
    x = jax.random.normal(kx, (batch, input_dimension), jnp.float32)

    params = init_linear_mdn_params(key, input_dimension, hidden_dims,
                                    output_dimension, n_mixtures)
    packed_hidden, packed_head = pack_linear_mdn_params(
        params, output_dimension, n_mixtures)

    mu, sigma, pi = linear_mdn_forward(
        x, packed_hidden, packed_head,
        output_dimension=output_dimension,
        n_mixtures=n_mixtures,
        compute_dtype=jnp.float32)   # use jnp.bfloat16 on v6e/v7x for MXU feed
    mu, sigma, pi = jax.block_until_ready((mu, sigma, pi))

    # Pure-JAX reference (same math as the PyTorch forward).
    h = x
    *hidden, (w_last, b_last) = params
    for (w, b) in hidden:
        h = jnp.maximum(h @ w + b, 0.0)
    z = h @ w_last + b_last
    K, D = n_mixtures, output_dimension
    mu_ref = z[:, :K * D].reshape(batch, K, D)
    sigma_ref = jnp.exp(z[:, K * D:K * D + K])
    pi_ref = jax.nn.softmax(z[:, K * D + K:K * D + 2 * K], axis=-1)

    assert mu.shape == (batch, n_mixtures, output_dimension)
    assert sigma.shape == (batch, n_mixtures)
    assert pi.shape == (batch, n_mixtures)
    assert jnp.allclose(mu, mu_ref, atol=1e-5, rtol=1e-5)
    assert jnp.allclose(sigma, sigma_ref, atol=1e-5, rtol=1e-5)
    assert jnp.allclose(pi, pi_ref, atol=1e-5, rtol=1e-5)

    print("KERNEL_OK")
</pallas_src>

<mosaic_0001>
module attributes {stable_mosaic.version = 11 : i64} {
  func.func @_fused_mdn_kernel(%arg0: i32, %arg1: memref<8x128xf32, #tpu.memory_space<vmem>>, %arg2: memref<128x128xf32, #tpu.memory_space<vmem>>, %arg3: memref<1x128xf32, #tpu.memory_space<vmem>>, %arg4: memref<128x128xf32, #tpu.memory_space<vmem>>, %arg5: memref<1x128xf32, #tpu.memory_space<vmem>>, %arg6: memref<128x128xf32, #tpu.memory_space<vmem>>, %arg7: memref<1x128xf32, #tpu.memory_space<vmem>>, %arg8: memref<128x128xf32, #tpu.memory_space<vmem>>, %arg9: memref<1x128xf32, #tpu.memory_space<vmem>>, %arg10: memref<128x128xf32, #tpu.memory_space<vmem>>, %arg11: memref<1x128xf32, #tpu.memory_space<vmem>>, %arg12: memref<8x128xf32, #tpu.memory_space<vmem>>, %arg13: memref<8x128xf32, #tpu.memory_space<vmem>>, %arg14: memref<8x128xf32, #tpu.memory_space<vmem>>) attributes {dimension_semantics = [#tpu.dimension_semantics<parallel>], iteration_bounds = array<i64: 1>, scalar_prefetch = 0 : i64, scratch_operands = 0 : i64, tpu.core_type = #tpu.core_type<tc>, window_params = [{transform_indices = @transform_0, window_bounds = array<i64: 8, 128>}, {pipeline_mode = #tpu.pipeline_mode<synchronous>, transform_indices = @transform_1, window_bounds = array<i64: 128, 128>}, {pipeline_mode = #tpu.pipeline_mode<synchronous>, transform_indices = @transform_2, window_bounds = array<i64: 1, 128>}, {pipeline_mode = #tpu.pipeline_mode<synchronous>, transform_indices = @transform_3, window_bounds = array<i64: 128, 128>}, {pipeline_mode = #tpu.pipeline_mode<synchronous>, transform_indices = @transform_4, window_bounds = array<i64: 1, 128>}, {pipeline_mode = #tpu.pipeline_mode<synchronous>, transform_indices = @transform_5, window_bounds = array<i64: 128, 128>}, {pipeline_mode = #tpu.pipeline_mode<synchronous>, transform_indices = @transform_6, window_bounds = array<i64: 1, 128>}, {pipeline_mode = #tpu.pipeline_mode<synchronous>, transform_indices = @transform_7, window_bounds = array<i64: 128, 128>}, {pipeline_mode = #tpu.pipeline_mode<synchronous>, transform_indices = @transform_8, window_bounds = array<i64: 1, 128>}, {pipeline_mode = #tpu.pipeline_mode<synchronous>, transform_indices = @transform_9, window_bounds = array<i64: 128, 128>}, {pipeline_mode = #tpu.pipeline_mode<synchronous>, transform_indices = @transform_10, window_bounds = array<i64: 1, 128>}, {transform_indices = @transform_11, window_bounds = array<i64: 8, 128>}, {transform_indices = @transform_12, window_bounds = array<i64: 8, 128>}, {transform_indices = @transform_13, window_bounds = array<i64: 8, 128>}]} {
    %c0 = arith.constant 0 : index
    %c0_0 = arith.constant 0 : index
    %0 = vector.load %arg1[%c0, %c0_0] : memref<8x128xf32, #tpu.memory_space<vmem>>, vector<8x128xf32>
    %c0_1 = arith.constant 0 : index
    %c0_2 = arith.constant 0 : index
    %1 = vector.load %arg2[%c0_1, %c0_2] : memref<128x128xf32, #tpu.memory_space<vmem>>, vector<128x128xf32>
    %c0_3 = arith.constant 0 : index
    %c0_4 = arith.constant 0 : index
    %2 = vector.load %arg3[%c0_3, %c0_4] : memref<1x128xf32, #tpu.memory_space<vmem>>, vector<1x128xf32>
    %cst = arith.constant dense<0.000000e+00> : vector<8x128xf32>
    %3 = tpu.matmul %0, %1, %cst {dimension_numbers = #tpu.dot_dimension_numbers<[1], [0], [0], [1], [0, 0, 1, 1], [], []>} : vector<8x128xf32>, vector<128x128xf32>, vector<8x128xf32> -> vector<8x128xf32>
    %4 = vector.broadcast %2 : vector<1x128xf32> to vector<8x128xf32>
    %5 = arith.addf %3, %4 : vector<8x128xf32>
    %cst_5 = arith.constant 0.000000e+00 : f32
    %6 = vector.broadcast %cst_5 : f32 to vector<8x128xf32>
    %7 = arith.maximumf %5, %6 : vector<8x128xf32>
    %c0_6 = arith.constant 0 : index
    %c0_7 = arith.constant 0 : index
    %8 = vector.load %arg4[%c0_6, %c0_7] : memref<128x128xf32, #tpu.memory_space<vmem>>, vector<128x128xf32>
    %c0_8 = arith.constant 0 : index
    %c0_9 = arith.constant 0 : index
    %9 = vector.load %arg5[%c0_8, %c0_9] : memref<1x128xf32, #tpu.memory_space<vmem>>, vector<1x128xf32>
    %cst_10 = arith.constant dense<0.000000e+00> : vector<8x128xf32>
    %10 = tpu.matmul %7, %8, %cst_10 {dimension_numbers = #tpu.dot_dimension_numbers<[1], [0], [0], [1], [0, 0, 1, 1], [], []>} : vector<8x128xf32>, vector<128x128xf32>, vector<8x128xf32> -> vector<8x128xf32>
    %11 = vector.broadcast %9 : vector<1x128xf32> to vector<8x128xf32>
    %12 = arith.addf %10, %11 : vector<8x128xf32>
    %cst_11 = arith.constant 0.000000e+00 : f32
    %13 = vector.broadcast %cst_11 : f32 to vector<8x128xf32>
    %14 = arith.maximumf %12, %13 : vector<8x128xf32>
    %c0_12 = arith.constant 0 : index
    %c0_13 = arith.constant 0 : index
    %15 = vector.load %arg6[%c0_12, %c0_13] : memref<128x128xf32, #tpu.memory_space<vmem>>, vector<128x128xf32>
    %c0_14 = arith.constant 0 : index
    %c0_15 = arith.constant 0 : index
    %16 = vector.load %arg7[%c0_14, %c0_15] : memref<1x128xf32, #tpu.memory_space<vmem>>, vector<1x128xf32>
    %c0_16 = arith.constant 0 : index
    %c0_17 = arith.constant 0 : index
    %17 = vector.load %arg8[%c0_16, %c0_17] : memref<128x128xf32, #tpu.memory_space<vmem>>, vector<128x128xf32>
    %c0_18 = arith.constant 0 : index
    %c0_19 = arith.constant 0 : index
    %18 = vector.load %arg9[%c0_18, %c0_19] : memref<1x128xf32, #tpu.memory_space<vmem>>, vector<1x128xf32>
    %c0_20 = arith.constant 0 : index
    %c0_21 = arith.constant 0 : index
    %19 = vector.load %arg10[%c0_20, %c0_21] : memref<128x128xf32, #tpu.memory_space<vmem>>, vector<128x128xf32>
    %c0_22 = arith.constant 0 : index
    %c0_23 = arith.constant 0 : index
    %20 = vector.load %arg11[%c0_22, %c0_23] : memref<1x128xf32, #tpu.memory_space<vmem>>, vector<1x128xf32>
    %cst_24 = arith.constant dense<0.000000e+00> : vector<8x128xf32>
    %21 = tpu.matmul %14, %15, %cst_24 {dimension_numbers = #tpu.dot_dimension_numbers<[1], [0], [0], [1], [0, 0, 1, 1], [], []>} : vector<8x128xf32>, vector<128x128xf32>, vector<8x128xf32> -> vector<8x128xf32>
    %22 = vector.broadcast %16 : vector<1x128xf32> to vector<8x128xf32>
    %23 = arith.addf %21, %22 : vector<8x128xf32>
    %cst_25 = arith.constant dense<0.000000e+00> : vector<8x128xf32>
    %24 = tpu.matmul %14, %17, %cst_25 {dimension_numbers = #tpu.dot_dimension_numbers<[1], [0], [0], [1], [0, 0, 1, 1], [], []>} : vector<8x128xf32>, vector<128x128xf32>, vector<8x128xf32> -> vector<8x128xf32>
    %25 = vector.broadcast %18 : vector<1x128xf32> to vector<8x128xf32>
    %26 = arith.addf %24, %25 : vector<8x128xf32>
    %cst_26 = arith.constant dense<0.000000e+00> : vector<8x128xf32>
    %27 = tpu.matmul %14, %19, %cst_26 {dimension_numbers = #tpu.dot_dimension_numbers<[1], [0], [0], [1], [0, 0, 1, 1], [], []>} : vector<8x128xf32>, vector<128x128xf32>, vector<8x128xf32> -> vector<8x128xf32>
    %28 = vector.broadcast %20 : vector<1x128xf32> to vector<8x128xf32>
    %29 = arith.addf %27, %28 : vector<8x128xf32>
    %30 = tpu.iota {dimensions = array<i32: 1>} : vector<8x128xi32>
    %c5_i32 = arith.constant 5 : i32
    %31 = vector.broadcast %c5_i32 : i32 to vector<8x128xi32>
    %32 = arith.cmpi slt, %30, %31 : vector<8x128xi32>
    %cst_27 = arith.constant 0xFF800000 : f32
    %33 = vector.broadcast %cst_27 : f32 to vector<8x128xf32>
    %34 = arith.select %32, %29, %33 : vector<8x128xi1>, vector<8x128xf32>
    %cst_28 = arith.constant dense<0xFF800000> : vector<8xf32>
    %35 = vector.multi_reduction <maximumf>, %34, %cst_28 [1] : vector<8x128xf32> to vector<8xf32>
    %36 = vector.shape_cast %35 : vector<8xf32> to vector<8x1xf32>
    %37 = vector.broadcast %36 : vector<8x1xf32> to vector<8x128xf32>
    %38 = arith.subf %34, %37 : vector<8x128xf32>
    %39 = math.exp %38 : vector<8x128xf32>
    %cst_29 = arith.constant dense<0.000000e+00> : vector<8xf32>
    %40 = vector.multi_reduction <add>, %39, %cst_29 [1] : vector<8x128xf32> to vector<8xf32>
    %41 = vector.shape_cast %40 : vector<8xf32> to vector<8x1xf32>
    %42 = vector.broadcast %41 : vector<8x1xf32> to vector<8x128xf32>
    %43 = arith.divf %39, %42 : vector<8x128xf32>
    %c0_30 = arith.constant 0 : index
    %c0_31 = arith.constant 0 : index
    %44 = vector.load %arg12[%c0_30, %c0_31] : memref<8x128xf32, #tpu.memory_space<vmem>>, vector<8x128xf32>
    tpu.vector_store %arg12[%c0_30, %c0_31], %23 {strides = array<i32>} : memref<8x128xf32, #tpu.memory_space<vmem>>, vector<8x128xf32>,
    %45 = math.exp %26 : vector<8x128xf32>
    %c0_32 = arith.constant 0 : index
    %c0_33 = arith.constant 0 : index
    %46 = vector.load %arg13[%c0_32, %c0_33] : memref<8x128xf32, #tpu.memory_space<vmem>>, vector<8x128xf32>
    tpu.vector_store %arg13[%c0_32, %c0_33], %45 {strides = array<i32>} : memref<8x128xf32, #tpu.memory_space<vmem>>, vector<8x128xf32>,
    %c0_34 = arith.constant 0 : index
    %c0_35 = arith.constant 0 : index
    %47 = vector.load %arg14[%c0_34, %c0_35] : memref<8x128xf32, #tpu.memory_space<vmem>>, vector<8x128xf32>
    tpu.vector_store %arg14[%c0_34, %c0_35], %43 {strides = array<i32>} : memref<8x128xf32, #tpu.memory_space<vmem>>, vector<8x128xf32>,
    return
  }
  func.func @transform_0(%arg0: i32) -> (i32, i32) {
    %c0_i32 = arith.constant 0 : i32
    %c0_i32_0 = arith.constant 0 : i32
    return %arg0, %c0_i32 : i32, i32
  }
  func.func @transform_1(%arg0: i32) -> (i32, i32) {
    %c0_i32 = arith.constant 0 : i32
    %c0_i32_0 = arith.constant 0 : i32
    %c0_i32_1 = arith.constant 0 : i32
    return %c0_i32, %c0_i32_0 : i32, i32
  }
  func.func @transform_2(%arg0: i32) -> (i32, i32) {
    %c0_i32 = arith.constant 0 : i32
    %c0_i32_0 = arith.constant 0 : i32
    %c0_i32_1 = arith.constant 0 : i32
    return %c0_i32, %c0_i32_0 : i32, i32
  }
  func.func @transform_3(%arg0: i32) -> (i32, i32) {
    %c0_i32 = arith.constant 0 : i32
    %c0_i32_0 = arith.constant 0 : i32
    %c0_i32_1 = arith.constant 0 : i32
    return %c0_i32, %c0_i32_0 : i32, i32
  }
  func.func @transform_4(%arg0: i32) -> (i32, i32) {
    %c0_i32 = arith.constant 0 : i32
    %c0_i32_0 = arith.constant 0 : i32
    %c0_i32_1 = arith.constant 0 : i32
    return %c0_i32, %c0_i32_0 : i32, i32
  }
  func.func @transform_5(%arg0: i32) -> (i32, i32) {
    %c0_i32 = arith.constant 0 : i32
    %c0_i32_0 = arith.constant 0 : i32
    %c0_i32_1 = arith.constant 0 : i32
    return %c0_i32, %c0_i32_0 : i32, i32
  }
  func.func @transform_6(%arg0: i32) -> (i32, i32) {
    %c0_i32 = arith.constant 0 : i32
    %c0_i32_0 = arith.constant 0 : i32
    %c0_i32_1 = arith.constant 0 : i32
    return %c0_i32, %c0_i32_0 : i32, i32
  }
  func.func @transform_7(%arg0: i32) -> (i32, i32) {
    %c0_i32 = arith.constant 0 : i32
    %c0_i32_0 = arith.constant 0 : i32
    %c0_i32_1 = arith.constant 0 : i32
    return %c0_i32, %c0_i32_0 : i32, i32
  }
  func.func @transform_8(%arg0: i32) -> (i32, i32) {
    %c0_i32 = arith.constant 0 : i32
    %c0_i32_0 = arith.constant 0 : i32
    %c0_i32_1 = arith.constant 0 : i32
    return %c0_i32, %c0_i32_0 : i32, i32
  }
  func.func @transform_9(%arg0: i32) -> (i32, i32) {
    %c0_i32 = arith.constant 0 : i32
    %c0_i32_0 = arith.constant 0 : i32
    %c0_i32_1 = arith.constant 0 : i32
    return %c0_i32, %c0_i32_0 : i32, i32
  }
  func.func @transform_10(%arg0: i32) -> (i32, i32) {
    %c0_i32 = arith.constant 0 : i32
    %c0_i32_0 = arith.constant 0 : i32
    %c0_i32_1 = arith.constant 0 : i32
    return %c0_i32, %c0_i32_0 : i32, i32
  }
  func.func @transform_11(%arg0: i32) -> (i32, i32) {
    %c0_i32 = arith.constant 0 : i32
    %c0_i32_0 = arith.constant 0 : i32
    return %arg0, %c0_i32 : i32, i32
  }
  func.func @transform_12(%arg0: i32) -> (i32, i32) {
    %c0_i32 = arith.constant 0 : i32
    %c0_i32_0 = arith.constant 0 : i32
    return %arg0, %c0_i32 : i32, i32
  }
  func.func @transform_13(%arg0: i32) -> (i32, i32) {
    %c0_i32 = arith.constant 0 : i32
    %c0_i32_0 = arith.constant 0 : i32
    return %arg0, %c0_i32 : i32, i32
  }
}

</mosaic_0001>

<bundles_post_ra>
// kernel: tpu_custom_call.1
= control target key start
LH: loop header
LB: loop body
LE: loop exit
PB: predicated region body
PF: predicated region fallthrough
CT: control target
= control target key end

     0   :  { %19 = vsyncpa [#allocation3], 0  ;;  %s1541_s0 = inlined_call_operand.hbm [shape: f32[8,128], index: 0, kind: input, shape index: {}]   ;;  %s1542_s1 = inlined_call_operand.hbm [shape: f32[128,128], index: 1, kind: input, shape index: {}]   ;;  %s1543_s2 = inlined_call_operand.vmem [shape: f32[1,128], index: 2, kind: input, shape index: {}]   ;;  %s1544_s3 = inlined_call_operand.hbm [shape: f32[128,128], index: 3, kind: input, shape index: {}]   ;;  %s1545_s4 = inlined_call_operand.vmem [shape: f32[1,128], index: 4, kind: input, shape index: {}]   ;;  %s1546_s5 = inlined_call_operand.hbm [shape: f32[128,128], index: 5, kind: input, shape index: {}]   ;;  %s1547_s6 = inlined_call_operand.vmem [shape: f32[1,128], index: 6, kind: input, shape index: {}]   ;;  %s1548_s7 = inlined_call_operand.hbm [shape: f32[128,128], index: 7, kind: input, shape index: {}]   ;;  %s1549_s8 = inlined_call_operand.vmem [shape: f32[1,128], index: 8, kind: input, shape index: {}]   ;;  %s1550_s9 = inlined_call_operand.hbm [shape: f32[128,128], index: 9, kind: input, shape index: {}]   ;;  %s1551_s10 = inlined_call_operand.vmem [shape: f32[1,128], index: 10, kind: input, shape index: {}]   ;;  %s1552_s11 = inlined_call_operand.hbm [shape: f32[8,128], index: 11, kind: output, shape index: {0}]   ;;  %s1553_s12 = inlined_call_operand.hbm [shape: f32[8,128], index: 12, kind: output, shape index: {1}]   ;;  %s1554_s13 = inlined_call_operand.hbm [shape: f32[8,128], index: 13, kind: output, shape index: {2}]  }
   0x1   :  { %20 = vsyncpa [#allocation6], 0 }
   0x2   :  { %21 = vsyncpa [#allocation9], 0 }
   0x3   :  { %22 = vsyncpa [#allocation12], 0 }
   0x4   :  { %23 = vsyncpa [#allocation4], 0 }
   0x5   :  { %24 = vsyncpa [#allocation15], 0  ;;  %s1269_s25 = smov [#allocation5]   ;;  %s1059_s29 = scalar_lea.hbm %s1542_s1, 2048 }
   0x6   :  { %s40_s26 = sshll.u32 %s1269_s25, 4  ;;  %p1060_p0 = scmp.ne.s32.totalorder %s1542_s1, %s1059_s29  ;;  %s41_s26 = int_to_ptr.vmem [resolvable:$true] %s40_s26 }
   0x7   :  { %p1063_p1 = scmp.lt.u32.totalorder %s1059_s29, %s1542_s1 }
   0x9   :  { %p1065_p2 = pnand %p1063_p1, %p1060_p0 }
   0xb   :  { %1068 = shalt.err (!%p1065_p2)
}
   0xc   :  { %s1069_s17 = scalar_lea.vmem %s41_s26, 2048  ;;  %p1074_p4 = scmp.lt.s32.totalorder %s41_s26, %s41_s26 }
   0xd   :  { %p1070_p3 = scmp.ne.s32.totalorder %s41_s26, %s1069_s17  ;;  %p1075_p5 = scmp.lt.s32.totalorder %s1069_s17, %s1069_s17 }
   0xf   :  { %p1076_p6 = por %p1075_p5, %p1074_p4 }
  0x11   :  { %p1077_p7 = pnand %p1076_p6, %p1070_p3 }
  0x13   :  { %1080 = shalt.err (!%p1077_p7)
}
  0x14   :  { %s1270_s18 = smov 128   ;;  %s1271_s19 = smov 8  }
  0x15   :  { %46 = dma.hbm_to_vmem [thread:$0]  %s1542_s1, 2048, %s41_s26, [#allocation6], %s1270_s18, %s1270_s18, %s1271_s19  }
  0x16   :  { %s1272_s22 = smov [#allocation8]   ;;  %s1273_s24 = smov [#allocation2]  }
  0x17   :  { %s68_s23 = sshll.u32 %s1272_s22, 4  ;;  %s31_s25 = sshll.u32 %s1273_s24, 4  ;;  %s69_s23 = int_to_ptr.vmem [resolvable:$true] %s68_s23  ;;  %s32_s25 = int_to_ptr.vmem [resolvable:$true] %s31_s25 }
  0x18   :  { %s1081_s29 = scalar_lea.hbm %s1546_s5, 2048 }
  0x19   :  { %p1082_p8 = scmp.ne.s32.totalorder %s1546_s5, %s1081_s29  ;;  %p1085_p9 = scmp.lt.u32.totalorder %s1081_s29, %s1546_s5 }
  0x1b   :  { %p1087_p10 = pnand %p1085_p9, %p1082_p8 }
  0x1d   :  { %1090 = shalt.err (!%p1087_p10)
}
  0x1e   :  { %s1091_s1 = scalar_lea.vmem %s69_s23, 2048  ;;  %p1096_p12 = scmp.lt.s32.totalorder %s69_s23, %s69_s23 }
  0x1f   :  { %p1092_p11 = scmp.ne.s32.totalorder %s69_s23, %s1091_s1  ;;  %p1097_p13 = scmp.lt.s32.totalorder %s1091_s1, %s1091_s1 }
  0x21   :  { %p1098_p0 = por %p1097_p13, %p1096_p12 }
  0x23   :  { %p1099_p1 = pnand %p1098_p0, %p1092_p11 }
  0x25   :  { %1102 = shalt.err (!%p1099_p1)
}
  0x26   :  { %74 = dma.hbm_to_vmem [thread:$0]  %s1546_s5, 2048, %s69_s23, [#allocation9], %s1270_s18, %s1270_s18, %s1271_s19  }
  0x27   :  { %s1103_s22 = scalar_lea.hbm %s1541_s0, 128 }
  0x28   :  { %p1104_p2 = scmp.ne.s32.totalorder %s1541_s0, %s1103_s22  ;;  %p1107_p3 = scmp.lt.u32.totalorder %s1103_s22, %s1541_s0 }
  0x2a   :  { %p1109_p4 = pnand %p1107_p3, %p1104_p2 }
  0x2c   :  { %1112 = shalt.err (!%p1109_p4)
}
  0x2d   :  { %s1113_s30 = scalar_lea.vmem %s32_s25, 128  ;;  %p1118_p6 = scmp.lt.s32.totalorder %s32_s25, %s32_s25 }
  0x2e   :  { %p1114_p5 = scmp.ne.s32.totalorder %s32_s25, %s1113_s30  ;;  %p1119_p7 = scmp.lt.s32.totalorder %s1113_s30, %s1113_s30 }
  0x30   :  { %p1120_p8 = por %p1119_p7, %p1118_p6 }
  0x32   :  { %p1121_p9 = pnand %p1120_p8, %p1114_p5 }
  0x34   :  { %1124 = shalt.err (!%p1121_p9)
}
  0x35   :  { %34 = dma.hbm_to_vmem [thread:$0]  %s1541_s0, 128, %s32_s25, [#allocation3]  }
  0x36   :  { %s1274_s14 = smov [#allocation7]   ;;  %s1275_s16 = smov [#allocation10]  }
  0x37   :  { %s54_s15 = sshll.u32 %s1274_s14, 4  ;;  %s82_s1 = sshll.u32 %s1275_s16, 4  ;;  %s55_s15 = int_to_ptr.vmem [resolvable:$true] %s54_s15  ;;  %s83_s1 = int_to_ptr.vmem [resolvable:$true] %s82_s1 }
  0x38   :  { %s1125_s20 = scalar_lea.hbm %s1544_s3, 2048 }
  0x39   :  { %p1126_p10 = scmp.ne.s32.totalorder %s1544_s3, %s1125_s20  ;;  %p1129_p11 = scmp.lt.u32.totalorder %s1125_s20, %s1544_s3 }
  0x3b   :  { %p1131_p12 = pnand %p1129_p11, %p1126_p10 }
  0x3d   :  { %1134 = shalt.err (!%p1131_p12)
}
  0x3e   :  { %s1135_s0 = scalar_lea.vmem %s55_s15, 2048  ;;  %p1140_p0 = scmp.lt.s32.totalorder %s55_s15, %s55_s15 }
  0x3f   :  { %p1136_p13 = scmp.ne.s32.totalorder %s55_s15, %s1135_s0  ;;  %p1141_p1 = scmp.lt.s32.totalorder %s1135_s0, %s1135_s0 }
  0x41   :  { %p1142_p2 = por %p1141_p1, %p1140_p0 }
  0x43   :  { %p1143_p3 = pnand %p1142_p2, %p1136_p13 }
  0x45   :  { %1146 = shalt.err (!%p1143_p3)
}
  0x46   :  { %60 = dma.hbm_to_vmem [thread:$0]  %s1544_s3, 2048, %s55_s15, [#allocation6], %s1270_s18, %s1270_s18, %s1271_s19  }
  0x47   :  { %s1147_s5 = scalar_lea.hbm %s1548_s7, 2048 }
  0x48   :  { %p1148_p4 = scmp.ne.s32.totalorder %s1548_s7, %s1147_s5  ;;  %p1151_p5 = scmp.lt.u32.totalorder %s1147_s5, %s1548_s7 }
  0x4a   :  { %p1153_p6 = pnand %p1151_p5, %p1148_p4 }
  0x4c   :  { %1156 = shalt.err (!%p1153_p6)
}
  0x4d   :  { %s1157_s17 = scalar_lea.vmem %s83_s1, 2048  ;;  %p1162_p8 = scmp.lt.s32.totalorder %s83_s1, %s83_s1 }
  0x4e   :  { %p1158_p7 = scmp.ne.s32.totalorder %s83_s1, %s1157_s17  ;;  %p1163_p9 = scmp.lt.s32.totalorder %s1157_s17, %s1157_s17 }
  0x50   :  { %p1164_p10 = por %p1163_p9, %p1162_p8 }
  0x52   :  { %p1165_p11 = pnand %p1164_p10, %p1158_p7 }
  0x54   :  { %1168 = shalt.err (!%p1165_p11)
}
  0x55   :  { %88 = dma.hbm_to_vmem [thread:$0]  %s1548_s7, 2048, %s83_s1, [#allocation9], %s1270_s18, %s1270_s18, %s1271_s19  }
  0x56   :  { %s1276_s20 = smov [#allocation11]   ;;  %s1169_s27 = scalar_lea.hbm %s1550_s9, 2048 }
  0x57   :  { %s96_s21 = sshll.u32 %s1276_s20, 4  ;;  %p1170_p12 = scmp.ne.s32.totalorder %s1550_s9, %s1169_s27  ;;  %s97_s21 = int_to_ptr.vmem [resolvable:$true] %s96_s21 }
  0x58   :  { %p1173_p13 = scmp.lt.u32.totalorder %s1169_s27, %s1550_s9 }
  0x5a   :  { %p1175_p0 = pnand %p1173_p13, %p1170_p12 }
  0x5c   :  { %1178 = shalt.err (!%p1175_p0)
}
  0x5d   :  { %s1179_s30 = scalar_lea.vmem %s97_s21, 2048  ;;  %p1184_p2 = scmp.lt.s32.totalorder %s97_s21, %s97_s21 }
  0x5e   :  { %p1180_p1 = scmp.ne.s32.totalorder %s97_s21, %s1179_s30  ;;  %p1185_p3 = scmp.lt.s32.totalorder %s1179_s30, %s1179_s30 }
  0x60   :  { %p1186_p4 = por %p1185_p3, %p1184_p2 }
  0x62   :  { %p1187_p5 = pnand %p1186_p4, %p1180_p1 }
  0x64   :  { %1190 = shalt.err (!%p1187_p5)
}
  0x65   :  { %102 = dma.hbm_to_vmem [thread:$0]  %s1550_s9, 2048, %s97_s21, [#allocation12], %s1270_s18, %s1270_s18, %s1271_s19  }
  0x66   :  { %1257 = dma.done.wait [#allocation3], 128  }
  0x67   :  { %1258 = vsyncadd [#allocation3], 4294967168 }
  0x68   :  { %1259 = dma.done.wait [#allocation6], 4096  }
  0x69   :  { %1260 = vsyncadd [#allocation6], 4294963200 }
  0x6a   :  { %1261 = dma.done.wait [#allocation9], 4096  }
  0x6b   :  { %1262 = vsyncadd [#allocation9], 4294963200 }
  0x6c   :  { %1263 = dma.done.wait [#allocation12], 2048  }
  0x6d   :  { %1264 = vsyncadd [#allocation12], 4294965248  ;;  %v1277_v0 = vmov 0.0|0.0   ;;  %vm1278_vm0 = vmmov 0   ;;  %v1279_v1 = vmov 0.0   ;;  %v124_v2 = vld [vmem:[#allocation5] sm:$0xff] }
  0x6e   :  { %919 = vmatprep.subr.bf16.mxu0 %v1277_v0  ;;  %776 = vmatprep.mubr.msk.f32.mxu0 %vm1278_vm0, %v1279_v1  ;;  %v125_v3 = vld [vmem:[#allocation5 + $0x8] sm:$0xff]  ;;  %v126_v4 = vld [vmem:[#allocation5 + $0x10] sm:$0xff]  ;;  %v127_v6 = vld [vmem:[#allocation5 + $0x18] sm:$0xff]  ;;  %s1281_s17 = smov [#allocation13]  }
  0x6f   :  { %943 = vmatprep.subr.bf16.mxu1 %v1277_v0  ;;  %811 = vmatprep.mubr.msk.f32.mxu1 %vm1278_vm0, %v1279_v1  ;;  %v920_v5 = vpack.c.bf16 %v125_v3, %v124_v2  ;;  %v923_v7 = vpack.c.bf16 %v127_v6, %v126_v4  ;;  %v128_v8 = vld [vmem:[#allocation5 + $0x20] sm:$0xff]  ;;  %v129_v9 = vld [vmem:[#allocation5 + $0x28] sm:$0xff]  ;;  %v220_v12 = vld [vmem:[#allocation7 + $0x10] sm:$0xff]  ;;  %s615_s3 = sshll.u32 %s1281_s17, 4  ;;  %s616_s3 = int_to_ptr.vmem [resolvable:$true] %s615_s3 }
  0x70   :  { %v218_v10 = vld [vmem:[#allocation7] sm:$0xff]  ;;  %v219_v11 = vld [vmem:[#allocation7 + $0x8] sm:$0xff]  ;;  %v221_v13 = vld [vmem:[#allocation7 + $0x18] sm:$0xff]  ;;  %v926_v14 = vpack.c.bf16 %v129_v9, %v128_v8 }
  0x71   :  { %921 = vmatpush3.bf16.msra.mxu0 %v920_v5  ;;  %v944_v15 = vpack.c.bf16 %v219_v11, %v218_v10  ;;  %v130_v16 = vld [vmem:[#allocation5 + $0x30] sm:$0xff]  ;;  %v131_v17 = vld [vmem:[#allocation5 + $0x38] sm:$0xff]  ;;  %v947_v18 = vpack.c.bf16 %v221_v13, %v220_v12  ;;  %v222_v19 = vld [vmem:[#allocation7 + $0x20] sm:$0xff] }
  0x72   :  { %922 = vmatprep.subr.bf16.mxu0 %v1277_v0  ;;  %v223_v20 = vld [vmem:[#allocation7 + $0x28] sm:$0xff]  ;;  %v929_v21 = vpack.c.bf16 %v131_v17, %v130_v16  ;;  %v132_v22 = vld [vmem:[#allocation5 + $0x40] sm:$0xff]  ;;  %v224_v25 = vld [vmem:[#allocation7 + $0x30] sm:$0xff] }
  0x73   :  { %945 = vmatpush3.bf16.msra.mxu1 %v944_v15  ;;  %v133_v23 = vld [vmem:[#allocation5 + $0x48] sm:$0xff]  ;;  %v950_v24 = vpack.c.bf16 %v223_v20, %v222_v19  ;;  %v225_v26 = vld [vmem:[#allocation7 + $0x38] sm:$0xff]  ;;  %v134_v28 = vld [vmem:[#allocation5 + $0x50] sm:$0xff] }
  0x74   :  { %946 = vmatprep.subr.bf16.mxu1 %v1277_v0  ;;  %v932_v27 = vpack.c.bf16 %v133_v23, %v132_v22  ;;  %v135_v29 = vld [vmem:[#allocation5 + $0x58] sm:$0xff]  ;;  %v953_v30 = vpack.c.bf16 %v225_v26, %v224_v25  ;;  %v226_v31 = vld [vmem:[#allocation7 + $0x40] sm:$0xff]  ;;  %v227_v32 = vld [vmem:[#allocation7 + $0x48] sm:$0xff] }
  0x75   :  { %924 = vmatpush3.bf16.msra.mxu0 %v923_v7  ;;  %v935_v33 = vpack.c.bf16 %v135_v29, %v134_v28  ;;  %v136_v34 = vld [vmem:[#allocation5 + $0x60] sm:$0xff]  ;;  %v137_v35 = vld [vmem:[#allocation5 + $0x68] sm:$0xff]  ;;  %v956_v36 = vpack.c.bf16 %v227_v32, %v226_v31  ;;  %v228_v37 = vld [vmem:[#allocation7 + $0x50] sm:$0xff] }
  0x76   :  { %925 = vmatprep.subr.bf16.mxu0 %v1277_v0  ;;  %v229_v38 = vld [vmem:[#allocation7 + $0x58] sm:$0xff]  ;;  %v938_v39 = vpack.c.bf16 %v137_v35, %v136_v34  ;;  %v138_v40 = vld [vmem:[#allocation5 + $0x70] sm:$0xff]  ;;  %v230_v43 = vld [vmem:[#allocation7 + $0x60] sm:$0xff] }
  0x77   :  { %948 = vmatpush3.bf16.msra.mxu1 %v947_v18  ;;  %v139_v41 = vld [vmem:[#allocation5 + $0x78] sm:$0xff]  ;;  %v959_v42 = vpack.c.bf16 %v229_v38, %v228_v37  ;;  %v231_v44 = vld [vmem:[#allocation7 + $0x68] sm:$0xff]  ;;  %v232_v48 = vld [vmem:[#allocation7 + $0x70] sm:$0xff] }
  0x78   :  { %949 = vmatprep.subr.bf16.mxu1 %v1277_v0  ;;  %v941_v45 = vpack.c.bf16 %v139_v41, %v138_v40  ;;  %v962_v46 = vpack.c.bf16 %v231_v44, %v230_v43  ;;  %v123_v47 = vld [vmem:[#allocation2] sm:$0xff]  ;;  %v312_v51 = vld [vmem:[#allocation8] sm:$0xff]  ;;  %v313_v52 = vld [vmem:[#allocation8 + $0x8] sm:$0xff] }
  0x79   :  { %927 = vmatpush3.bf16.msra.mxu0 %v926_v14  ;;  %v233_v49 = vld [vmem:[#allocation7 + $0x78] sm:$0xff]  ;;  %v968_v53 = vpack.c.bf16 %v313_v52, %v312_v51  ;;  %v314_v54 = vld [vmem:[#allocation8 + $0x10] sm:$0xff]  ;;  %v316_v57 = vld [vmem:[#allocation8 + $0x20] sm:$0xff] }
  0x7a   :  { %928 = vmatprep.subr.bf16.mxu0 %v1277_v0  ;;  %v965_v50 = vpack.c.bf16 %v233_v49, %v232_v48  ;;  %v315_v55 = vld [vmem:[#allocation8 + $0x18] sm:$0xff]  ;;  %v317_v58 = vld [vmem:[#allocation8 + $0x28] sm:$0xff]  ;;  %v318_v60 = vld [vmem:[#allocation8 + $0x30] sm:$0xff] }
  0x7b   :  { %951 = vmatpush3.bf16.msra.mxu1 %v950_v24  ;;  %v971_v56 = vpack.c.bf16 %v315_v55, %v314_v54  ;;  %v974_v59 = vpack.c.bf16 %v317_v58, %v316_v57  ;;  %v319_v61 = vld [vmem:[#allocation8 + $0x38] sm:$0xff]  ;;  %v320_v63 = vld [vmem:[#allocation8 + $0x40] sm:$0xff]  ;;  %v321_v2 = vld [vmem:[#allocation8 + $0x48] sm:$0xff] }
  0x7c   :  { %952 = vmatprep.subr.bf16.mxu1 %v1277_v0  ;;  %v977_v62 = vpack.c.bf16 %v319_v61, %v318_v60  ;;  %v980_v3 = vpack.c.bf16 %v321_v2, %v320_v63  ;;  %v322_v4 = vld [vmem:[#allocation8 + $0x50] sm:$0xff]  ;;  %v323_v5 = vld [vmem:[#allocation8 + $0x58] sm:$0xff]  ;;  %v324_v7 = vld [vmem:[#allocation8 + $0x60] sm:$0xff] }
  0x7d   :  { %930 = vmatpush3.bf16.msra.mxu0 %v929_v21  ;;  %v983_v6 = vpack.c.bf16 %v323_v5, %v322_v4  ;;  %v325_v8 = vld [vmem:[#allocation8 + $0x68] sm:$0xff]  ;;  %v654_v10 = vld [vmem:[%s1543_s2] ss:$0 sm:$0xff]  ;;  %v329_v11 = vld [vmem:[#allocation10] sm:$0xff] }
  0x7e   :  { %931 = vmatprep.subr.bf16.mxu0 %v1277_v0  ;;  %v986_v9 = vpack.c.bf16 %v325_v8, %v324_v7  ;;  %v330_v12 = vld [vmem:[#allocation10 + $0x8] sm:$0xff]  ;;  %v331_v18 = vld [vmem:[#allocation10 + $0x10] sm:$0xff]  ;;  %v332_v19 = vld [vmem:[#allocation10 + $0x18] sm:$0xff] }
  0x7f   :  { %954 = vmatpush3.bf16.msra.mxu1 %v953_v30  ;;  %v992_v16 = vpack.c.bf16 %v330_v12, %v329_v11  ;;  %v995_v20 = vpack.c.bf16 %v332_v19, %v331_v18  ;;  %v333_v21 = vld [vmem:[#allocation10 + $0x20] sm:$0xff]  ;;  %v334_v22 = vld [vmem:[#allocation10 + $0x28] sm:$0xff]  ;;  %v335_v24 = vld [vmem:[#allocation10 + $0x30] sm:$0xff] }
  0x80   :  { %955 = vmatprep.subr.bf16.mxu1 %v1277_v0  ;;  %v998_v23 = vpack.c.bf16 %v334_v22, %v333_v21  ;;  %v336_v25 = vld [vmem:[#allocation10 + $0x38] sm:$0xff]  ;;  %v338_v28 = vld [vmem:[#allocation10 + $0x48] sm:$0xff]  ;;  %v339_v30 = vld [vmem:[#allocation10 + $0x50] sm:$0xff] }
  0x81   :  { %933 = vmatpush3.bf16.msra.mxu0 %v932_v27  ;;  %v1001_v26 = vpack.c.bf16 %v336_v25, %v335_v24  ;;  %v337_v27 = vld [vmem:[#allocation10 + $0x40] sm:$0xff]  ;;  %v340_v31 = vld [vmem:[#allocation10 + $0x58] sm:$0xff]  ;;  %v342_v34 = vld [vmem:[#allocation10 + $0x68] sm:$0xff] }
  0x82   :  { %934 = vmatprep.subr.bf16.mxu0 %v1277_v0  ;;  %v1004_v29 = vpack.c.bf16 %v338_v28, %v337_v27  ;;  %v1007_v32 = vpack.c.bf16 %v340_v31, %v339_v30  ;;  %v327_v37 = vld [vmem:[#allocation8 + $0x78] sm:$0xff]  ;;  %v346_v43 = vld [vmem:[#allocation11] sm:$0xff]  ;;  %v347_v44 = vld [vmem:[#allocation11 + $0x8] sm:$0xff] }
  0x83   :  { %957 = vmatpush3.bf16.msra.mxu1 %v956_v36  ;;  %v326_v36 = vld [vmem:[#allocation8 + $0x70] sm:$0xff]  ;;  %v344_v40 = vld [vmem:[#allocation10 + $0x78] sm:$0xff]  ;;  %v1016_v48 = vpack.c.bf16 %v347_v44, %v346_v43  ;;  %v351_v54 = vld [vmem:[#allocation11 + $0x28] sm:$0xff] }
  0x84   :  { %958 = vmatprep.subr.bf16.mxu1 %v1277_v0  ;;  %v989_v38 = vpack.c.bf16 %v327_v37, %v326_v36  ;;  %v349_v51 = vld [vmem:[#allocation11 + $0x18] sm:$0xff]  ;;  %v355_v60 = vld [vmem:[#allocation11 + $0x48] sm:$0xff]  ;;  %v358_v2 = vld [vmem:[#allocation11 + $0x60] sm:$0xff] }
  0x85   :  { %936 = vmatpush3.bf16.msra.mxu0 %v935_v33  ;;  %v341_v33 = vld [vmem:[#allocation10 + $0x60] sm:$0xff]  ;;  %v353_v57 = vld [vmem:[#allocation11 + $0x38] sm:$0xff]  ;;  %v360_v5 = vld [vmem:[#allocation11 + $0x70] sm:$0xff] }
  0x86   :  { %937 = vmatprep.subr.bf16.mxu0 %v1277_v0  ;;  %v1010_v35 = vpack.c.bf16 %v342_v34, %v341_v33  ;;  %v656_v8 = vld [vmem:[%s1547_s6] ss:$0 sm:$0xff]  ;;  %s1280_s6 = smov [#allocation14]  }
  0x87   :  { %960 = vmatpush3.bf16.msra.mxu1 %v959_v42  ;;  %v655_v42 = vld [vmem:[%s1545_s4] ss:$0 sm:$0xff] }
  0x88   :  { %961 = vmatprep.subr.bf16.mxu1 %v1277_v0  ;;  %v658_v19 = vld [vmem:[%s1551_s10] ss:$0 sm:$0xff] }
  0x89   :  { %939 = vmatpush3.bf16.msra.mxu0 %v938_v39  ;;  %v343_v39 = vld [vmem:[#allocation10 + $0x70] sm:$0xff] }
  0x8a   :  { %940 = vmatprep.subr.bf16.mxu0 %v1277_v0  ;;  %v1013_v41 = vpack.c.bf16 %v344_v40, %v343_v39 }
  0x8b   :  { %963 = vmatpush3.bf16.msra.mxu1 %v962_v46 }
  0x8c   :  { %964 = vmatprep.subr.bf16.mxu1 %v1277_v0 }
  0x8d   :  { %942 = vmatpush3.bf16.msra.mxu0 %v941_v45 }
  0x8e   :  { %967 = vmatprep.subr.bf16.mxu0 %v1277_v0 }
  0x8f   :  { %966 = vmatpush3.bf16.msra.mxu1 %v965_v50  ;;  %v348_v50 = vld [vmem:[#allocation11 + $0x10] sm:$0xff] }
  0x90   :  { %777 = vmatmul.mubr.f32.vlgmr.msra.gmra.mrb[0].mxu0 %v123_v47  ;;  %991 = vmatprep.subr.bf16.mxu1 %v1277_v0  ;;  %v1019_v52 = vpack.c.bf16 %v349_v51, %v348_v50 }
  0x91   :  { %846 = vmatprep.mubr.msk.f32.mxu0 %vm1278_vm0, %v1279_v1  ;;  %969 = vmatpush3.bf16.msra.mxu0 %v968_v53  ;;  %v350_v53 = vld [vmem:[#allocation11 + $0x20] sm:$0xff] }
  0x92   :  { %970 = vmatprep.subr.bf16.mxu0 %v1277_v0  ;;  %v1022_v55 = vpack.c.bf16 %v351_v54, %v350_v53 }
  0x95   :  { %972 = vmatpush3.bf16.msra.mxu0 %v971_v56  ;;  %v352_v56 = vld [vmem:[#allocation11 + $0x30] sm:$0xff] }
  0x96   :  { %973 = vmatprep.subr.bf16.mxu0 %v1277_v0  ;;  %v1025_v58 = vpack.c.bf16 %v353_v57, %v352_v56 }
  0x99   :  { %975 = vmatpush3.bf16.msra.mxu0 %v974_v59  ;;  %v354_v59 = vld [vmem:[#allocation11 + $0x40] sm:$0xff] }
  0x9a   :  { %976 = vmatprep.subr.bf16.mxu0 %v1277_v0  ;;  %v1028_v61 = vpack.c.bf16 %v355_v60, %v354_v59 }
  0x9d   :  { %978 = vmatpush3.bf16.msra.mxu0 %v977_v62  ;;  %v357_v62 = vld [vmem:[#allocation11 + $0x58] sm:$0xff] }
  0x9e   :  { %979 = vmatprep.subr.bf16.mxu0 %v1277_v0 }
  0xa1   :  { %981 = vmatpush3.bf16.msra.mxu0 %v980_v3  ;;  %v359_v3 = vld [vmem:[#allocation11 + $0x68] sm:$0xff] }
  0xa2   :  { %982 = vmatprep.subr.bf16.mxu0 %v1277_v0  ;;  %v1034_v4 = vpack.c.bf16 %v359_v3, %v358_v2 }
  0xa5   :  { %984 = vmatpush3.bf16.msra.mxu0 %v983_v6  ;;  %v361_v6 = vld [vmem:[#allocation11 + $0x78] sm:$0xff] }
  0xa6   :  { %985 = vmatprep.subr.bf16.mxu0 %v1277_v0  ;;  %v1037_v7 = vpack.c.bf16 %v361_v6, %v360_v5 }
  0xa9   :  { %987 = vmatpush3.bf16.msra.mxu0 %v986_v9  ;;  %v657_v9 = vld [vmem:[%s1549_s8] ss:$0 sm:$0xff]  ;;  %s625_s8 = sshll.u32 %s1280_s6, 4  ;;  %s626_s8 = int_to_ptr.vmem [resolvable:$true] %s625_s8 }
  0xaa   :  { %988 = vmatprep.subr.bf16.mxu0 %v1277_v0  ;;  %s1191_s15 = scalar_lea.vmem %s626_s8, 128  ;;  %p1196_p7 = scmp.lt.s32.totalorder %s626_s8, %s626_s8 }
  0xab   :  { %p1192_p6 = scmp.ne.s32.totalorder %s626_s8, %s1191_s15  ;;  %p1197_p8 = scmp.lt.s32.totalorder %s1191_s15, %s1191_s15 }
  0xad   :  { %990 = vmatpush3.bf16.msra.mxu0 %v989_v38  ;;  %p1198_p9 = por %p1197_p8, %p1196_p7 }
  0xae   :  { %1015 = vmatprep.subr.bf16.mxu0 %v1277_v0 }
  0xaf   :  { %p1199_p10 = pnand %p1198_p9, %p1192_p6 }
 0x163   :  { %v213_v13 = vpop.f32.mrb[0].mxu0 }
 0x164   :  { %v214_v14 = vadd.f32 %v654_v10, %v213_v13  ;;  %v778_v15 = vpop.f32.mrb[1].mxu0 }
 0x166   :  { %v217_v17 = vmax.f32 %v214_v14, 0.0 }
 0x168   :  { %812 = vmatmul.mubr.f32.vlgmr.msra.gmra.mrb[0].mxu1 %v217_v17  ;;  %v591_v17 = vlaneseq }
 0x169   :  { %993 = vmatpush3.bf16.msra.mxu1 %v992_v16  ;;  %881 = vmatprep.mubr.msk.f32.mxu1 %vm1278_vm0, %v1279_v1 }
 0x16a   :  { %994 = vmatprep.subr.bf16.mxu1 %v1277_v0  ;;  %v592_v18 = vand.u32 127, %v591_v17 }
 0x16c   :  { %vm593_vm1 = vcmp.lt.s32.totalorder %v592_v18, 5 }
 0x16d   :  { %996 = vmatpush3.bf16.msra.mxu1 %v995_v20 }
 0x16e   :  { %997 = vmatprep.subr.bf16.mxu1 %v1277_v0 }
 0x171   :  { %999 = vmatpush3.bf16.msra.mxu1 %v998_v23 }
 0x172   :  { %1000 = vmatprep.subr.bf16.mxu1 %v1277_v0 }
 0x175   :  { %1002 = vmatpush3.bf16.msra.mxu1 %v1001_v26 }
 0x176   :  { %1003 = vmatprep.subr.bf16.mxu1 %v1277_v0 }
 0x179   :  { %1005 = vmatpush3.bf16.msra.mxu1 %v1004_v29 }
 0x17a   :  { %1006 = vmatprep.subr.bf16.mxu1 %v1277_v0 }
 0x17d   :  { %1008 = vmatpush3.bf16.msra.mxu1 %v1007_v32 }
 0x17e   :  { %1009 = vmatprep.subr.bf16.mxu1 %v1277_v0 }
 0x181   :  { %1011 = vmatpush3.bf16.msra.mxu1 %v1010_v35 }
 0x182   :  { %1012 = vmatprep.subr.bf16.mxu1 %v1277_v0 }
 0x185   :  { %1014 = vmatpush3.bf16.msra.mxu1 %v1013_v41 }
 0x23b   :  { %v307_v45 = vpop.f32.mrb[0].mxu1 }
 0x23c   :  { %v308_v46 = vadd.f32 %v655_v42, %v307_v45  ;;  %v813_v47 = vpop.f32.mrb[1].mxu1 }
 0x23e   :  { %v311_v49 = vmax.f32 %v308_v46, 0.0 }
 0x240   :  { %847 = vmatmul.mubr.f32.vlgmr.msra.gmra.mrb[2].mxu0 %v311_v49  ;;  %882 = vmatmul.mubr.f32.vlgmr.msra.gmra.mrb[2].mxu1 %v311_v49 }
 0x241   :  { %1017 = vmatpush3.bf16.msra.mxu0 %v1016_v48  ;;  %916 = vmatprep.mubr.msk.f32.mxu0 %vm1278_vm0, %v1279_v1  ;;  %v356_v1 = vld [vmem:[#allocation11 + $0x50] sm:$0xff] }
 0x242   :  { %1018 = vmatprep.subr.bf16.mxu0 %v1277_v0  ;;  %v1031_v63 = vpack.c.bf16 %v357_v62, %v356_v1 }
 0x245   :  { %1020 = vmatpush3.bf16.msra.mxu0 %v1019_v52 }
 0x246   :  { %1021 = vmatprep.subr.bf16.mxu0 %v1277_v0 }
 0x249   :  { %1023 = vmatpush3.bf16.msra.mxu0 %v1022_v55 }
 0x24a   :  { %1024 = vmatprep.subr.bf16.mxu0 %v1277_v0 }
 0x24d   :  { %1026 = vmatpush3.bf16.msra.mxu0 %v1025_v58 }
 0x24e   :  { %1027 = vmatprep.subr.bf16.mxu0 %v1277_v0 }
 0x251   :  { %1029 = vmatpush3.bf16.msra.mxu0 %v1028_v61 }
 0x252   :  { %1030 = vmatprep.subr.bf16.mxu0 %v1277_v0 }
 0x255   :  { %1032 = vmatpush3.bf16.msra.mxu0 %v1031_v63 }
 0x256   :  { %1033 = vmatprep.subr.bf16.mxu0 %v1277_v0 }
 0x259   :  { %1035 = vmatpush3.bf16.msra.mxu0 %v1034_v4 }
 0x25a   :  { %1036 = vmatprep.subr.bf16.mxu0 %v1277_v0 }
 0x25d   :  { %1038 = vmatpush3.bf16.msra.mxu0 %v1037_v7 }
 0x260   :  { %917 = vmatmul.mubr.f32.vlgmr.msra.gmra.mrb[4].mxu0 %v311_v49 }
 0x313   :  { %v435_v10 = vpop.f32.mrb[2].mxu0  ;;  %v511_v11 = vpop.f32.mrb[2].mxu1 }
 0x314   :  { %v436_v12 = vadd.f32 %v656_v8, %v435_v10  ;;  %v512_v13 = vadd.f32 %v657_v9, %v511_v11  ;;  %v848_v14 = vpop.f32.mrb[3].mxu0  ;;  %v883_v15 = vpop.f32.mrb[3].mxu1 }
 0x316   :  { %604 = vst [vmem:[#allocation13] sm:$0xff] %v436_v12  ;;  %v605_v16 = vmul.f32 1.442695, %v512_v13 }
 0x318   :  { %1053 = vpow2.f32 %v605_v16 }
 0x322   :  { %v1054_v0 = vpop.eup %1053 }
 0x323   :  { %607 = vst [vmem:[#allocation14] sm:$0xff] %v1054_v0 }
 0x333   :  { %v587_v20 = vpop.f32.mrb[4].mxu0 }
 0x334   :  { %v588_v21 = vadd.f32 %v658_v19, %v587_v20  ;;  %v918_v22 = vpop.f32.mrb[5].mxu0 }
 0x336   :  { %v594_v23 = vsel %vm593_vm1, %v588_v21, -inf }
 0x337   :  { %595 = vmax.xlane.f32.xlu0 %v594_v23 }
 0x3c4   :  { %v596_v24 = vpop.xlane.xlu0 %595 }
 0x3c5   :  { %v597_v25 = vsub.f32 %v594_v23, %v596_v24 }
 0x3c7   :  { %v598_v26 = vmul.f32 1.442695, %v597_v25 }
 0x3c9   :  { %1055 = vpow2.f32 %v598_v26 }
 0x3d3   :  { %v1056_v27 = vpop.eup %1055 }
 0x3d4   :  { %600 = vadd.xlane.f32.xlu0 %v1056_v27 }
 0x3d5   :  { %1202 = shalt.err (!%p1199_p10)
}
 0x3d6   :  { %s1203_s21 = scalar_lea.hbm %s1553_s12, 128 }
 0x3d7   :  { %p1204_p11 = scmp.ne.s32.totalorder %s1553_s12, %s1203_s21  ;;  %p1207_p12 = scmp.lt.u32.totalorder %s1203_s21, %s1553_s12 }
 0x3d9   :  { %p1209_p13 = pnand %p1207_p12, %p1204_p11 }
 0x3db   :  { %1212 = shalt.err (!%p1209_p13)
}
 0x3dc   :  { %628 = dma.vmem_to_hbm [thread:$0]  %s626_s8, 128, %s1553_s12, [#allocation15]  }
 0x3dd   :  { %s1213_s29 = scalar_lea.vmem %s616_s3, 128  ;;  %p1218_p1 = scmp.lt.s32.totalorder %s616_s3, %s616_s3 }
 0x3de   :  { %p1214_p0 = scmp.ne.s32.totalorder %s616_s3, %s1213_s29  ;;  %p1219_p2 = scmp.lt.s32.totalorder %s1213_s29, %s1213_s29 }
 0x3e0   :  { %p1220_p3 = por %p1219_p2, %p1218_p1 }
 0x3e2   :  { %p1221_p4 = pnand %p1220_p3, %p1214_p0 }
 0x3e4   :  { %1224 = shalt.err (!%p1221_p4)
}
 0x3e5   :  { %s1225_s1 = scalar_lea.hbm %s1552_s11, 128 }
 0x3e6   :  { %p1226_p5 = scmp.ne.s32.totalorder %s1552_s11, %s1225_s1  ;;  %p1229_p6 = scmp.lt.u32.totalorder %s1225_s1, %s1552_s11 }
 0x3e8   :  { %p1231_p7 = pnand %p1229_p6, %p1226_p5 }
 0x3ea   :  { %1234 = shalt.err (!%p1231_p7)
}
 0x3eb   :  { %618 = dma.vmem_to_hbm [thread:$0]  %s616_s3, 128, %s1552_s11, [#allocation4]  }
 0x3ec   :  { %s1282_s5 = smov [#allocation16]  }
 0x3ed   :  { %s635_s23 = sshll.u32 %s1282_s5, 4  ;;  %s636_s23 = int_to_ptr.vmem [resolvable:$true] %s635_s23 }
 0x3ee   :  { %s1235_s14 = scalar_lea.vmem %s636_s23, 128  ;;  %p1240_p9 = scmp.lt.s32.totalorder %s636_s23, %s636_s23 }
 0x3ef   :  { %p1236_p8 = scmp.ne.s32.totalorder %s636_s23, %s1235_s14  ;;  %p1241_p10 = scmp.lt.s32.totalorder %s1235_s14, %s1235_s14 }
 0x3f1   :  { %p1242_p11 = por %p1241_p10, %p1240_p9 }
 0x3f3   :  { %p1243_p12 = pnand %p1242_p11, %p1236_p8 }
 0x461   :  { %v601_v28 = vpop.xlane.xlu0 %600 }
 0x462   :  { %1057 = vrcp.f32 %v601_v28 }
 0x46c   :  { %v1058_v29 = vpop.eup %1057 }
 0x46d   :  { %v603_v30 = vmul.f32 %v1058_v29, %v1056_v27 }
 0x46f   :  { %608 = vst [vmem:[#allocation16] sm:$0xff] %v603_v30 }
 0x470   :  { %1246 = shalt.err (!%p1243_p12)
}
 0x471   :  { %s1247_s6 = scalar_lea.hbm %s1554_s13, 128 }
 0x472   :  { %p1248_p13 = scmp.ne.s32.totalorder %s1554_s13, %s1247_s6  ;;  %p1251_p0 = scmp.lt.u32.totalorder %s1247_s6, %s1554_s13 }
 0x474   :  { %p1253_p1 = pnand %p1251_p0, %p1248_p13 }
 0x476   :  { %1256 = shalt.err (!%p1253_p1)
}
 0x477   :  { %638 = dma.vmem_to_hbm [thread:$0]  %s636_s23, 128, %s1554_s13, [#allocation15]  }
 0x478   :  { %1265 = dma.done.wait [#allocation4], 128  }
 0x479   :  { %1266 = vsyncadd [#allocation4], 4294967168 }
 0x47a   :  { %1267 = dma.done.wait [#allocation15], 256  }
 0x47b   :  { %1268 = vsyncadd [#allocation15], 4294967040 }
 0x47c   :  { %648 = vsyncpa [#allocation3], 1 }
 0x47d   :  { %649 = vsyncpa [#allocation6], 1 }
 0x47e   :  { %650 = vsyncpa [#allocation9], 1 }
 0x47f   :  { %651 = vsyncpa [#allocation12], 1 }
 0x480   :  { %652 = vsyncpa [#allocation4], 1 }
 0x481   :  { %653 = vsyncpa [#allocation15], 1 }

</bundles_post_ra>
